<compile_context>
chip_gen: v7x
topology: tpu7x:2x2x1
jax: 0.10.0
libtpu: 0.0.40
codegen_flags: <defaults>
</compile_context>

<pallas_src>
import jax
import jax.numpy as jnp
from jax.experimental import pallas as pl
from jax.experimental.pallas import tpu as pltpu

LANE = 128            # vreg lane width
SUBLANE = 8           # f32 sublane count
FEAT = 2              # in_features of Linear(2, 1)
MAX_TILE_ROWS = 2048  # (2048,256) f32 in + (2048,128) f32 out = 3 MiB/step
                      # (~87% of HBM roofline after the ~0.35us/step overhead)


def _lin_kernel(b_ref, x_ref, w_ref, o_ref):
    """One row-tile of Linear(2, 1).

    b_ref: SMEM (1,)       bias scalar.
    x_ref: VMEM (tb, 256)  interleaved features: lane 2c / 2c+1 hold
                           x[:, 0] / x[:, 1] of batch element 128*r + c.
    w_ref: VMEM (256, 128) deinterleave+weight matrix (constant over the grid):
                           W[2c, c] = w00, W[2c+1, c] = w01, else 0.
    o_ref: VMEM (tb, 128)  lane-dense output, o[r, c] = batch element 128*r + c.
    """
    o_ref[...] = (
        jnp.dot(x_ref[...], w_ref[...], preferred_element_type=jnp.float32)
        + b_ref[0]
    )


def _choose_tile_rows(rows):
    """Largest tile that amortizes the ~0.35us/step overhead, while keeping
    >=2 grid steps once the problem is big enough to pipeline and to shard
    the row axis across v7x's two TensorCores."""
    if rows <= 1024:                      # small problem: one overhead-free step
        return rows
    steps = max(2, -(-rows // MAX_TILE_ROWS))
    tb = -(-rows // steps)
    return ((tb + SUBLANE - 1) // SUBLANE) * SUBLANE


@jax.jit
def lin_forward(x, weight, bias):
    """Pallas TPU implementation of torch.nn.Linear(2, 1) forward.

    x: (B, 2) f32, weight: (1, 2) f32 (PyTorch out x in), bias: (1,) f32.
    Returns (B, 1) f32.
    """
    B, in_features = x.shape
    assert in_features == FEAT and weight.shape == (1, FEAT) and bias.shape == (1,)
    x = x.astype(jnp.float32)

    # Batch -> (row, lane): batch element n lives at row n // 128, lane n % 128.
    rows = -(-B // LANE)
    rows = max(SUBLANE, ((rows + SUBLANE - 1) // SUBLANE) * SUBLANE)
    tb = _choose_tile_rows(rows)
    rows = ((rows + tb - 1) // tb) * tb          # rows divisible by the tile
    n_elems = rows * FEAT * LANE

    # Flat row-major x is already interleaved; no deinterleave pass in the
    # wrapper.  Pad only when B is not tile-aligned (single fused pass).
    x_flat = x.reshape(-1)
    if n_elems != FEAT * B:
        x_flat = jnp.pad(x_flat, (0, n_elems - FEAT * B))
    x_slab = x_flat.reshape(rows, FEAT * LANE)   # (rows, 256)

    # (256, 128) deinterleave+weight matrix (tiny, fetched once by the kernel).
    eye = jnp.eye(LANE, dtype=jnp.float32)
    w_mat = jnp.stack([weight[0, 0] * eye, weight[0, 1] * eye], axis=1)
    w_mat = w_mat.reshape(FEAT * LANE, LANE)

    b_smem = bias.astype(jnp.float32).reshape(1)

    out2d = pl.pallas_call(
        _lin_kernel,
        out_shape=jax.ShapeDtypeStruct((rows, LANE), jnp.float32),
        grid=(rows // tb,),
        in_specs=[
            pl.BlockSpec(memory_space=pltpu.MemorySpace.SMEM),    # bias scalar
            pl.BlockSpec((tb, FEAT * LANE), lambda i: (i, 0)),    # x tile
            pl.BlockSpec((FEAT * LANE, LANE), lambda i: (0, 0)),  # W (constant)
        ],
        out_specs=pl.BlockSpec((tb, LANE), lambda i: (i, 0)),
        compiler_params=pltpu.CompilerParams(
            dimension_semantics=("parallel",),
        ),
    )(b_smem, x_slab, w_mat)

    # out2d is the lane-dense (rows, 128) result; a downstream Pallas consumer
    # should take it directly.  Materialize the PyTorch (B, 1) layout only at
    # the boundary -- free when B is tile-aligned, one flat slice otherwise.
    if rows * LANE == B:
        return out2d.reshape(B, 1)
    return out2d.reshape(rows * LANE)[:B].reshape(B, 1)


if __name__ == "__main__":
    key = jax.random.PRNGKey(0)
    kx, kw, kb, kx2 = jax.random.split(key, 4)

    B, IN, OUT = 8, 2, 1

    # Deterministic parameters (same shapes as torch.nn.Linear(2, 1)).
    weight = jax.random.uniform(kw, (OUT, IN), dtype=jnp.float32,
                                minval=-1.0, maxval=1.0)
    bias = jax.random.uniform(kb, (OUT,), dtype=jnp.float32,
                              minval=-1.0, maxval=1.0)

    # Primary small-shape run (exercises pad + trim path).
    x = jax.random.normal(kx, (B, IN), dtype=jnp.float32)
    out = jax.block_until_ready(lin_forward(x, weight, bias))
    ref = x @ weight.T + bias
    assert out.shape == (B, OUT)
    assert jnp.allclose(out, ref, atol=1e-5, rtol=1e-5)

    # Lane-aligned batch (exercises the zero-copy wrapper fast path).
    B2 = 1024
    x2 = jax.random.normal(kx2, (B2, IN), dtype=jnp.float32)
    out2 = jax.block_until_ready(lin_forward(x2, weight, bias))
    ref2 = x2 @ weight.T + bias
    assert out2.shape == (B2, OUT)
    assert jnp.allclose(out2, ref2, atol=1e-5, rtol=1e-5)

    print("KERNEL_OK")
</pallas_src>

<mosaic_0001>
module attributes {stable_mosaic.version = 11 : i64} {
  func.func @_lin_kernel(%arg0: i32, %arg1: memref<1xf32, #tpu.memory_space<smem>>, %arg2: memref<8x256xf32, #tpu.memory_space<vmem>>, %arg3: memref<256x128xf32, #tpu.memory_space<vmem>>, %arg4: memref<8x128xf32, #tpu.memory_space<vmem>>) attributes {dimension_semantics = [#tpu.dimension_semantics<parallel>], iteration_bounds = array<i64: 1>, scalar_prefetch = 0 : i64, scratch_operands = 0 : i64, tpu.core_type = #tpu.core_type<tc>, window_params = [{transform_indices = @transform_0, window_bounds = array<i64: 1>}, {transform_indices = @transform_1, window_bounds = array<i64: 8, 256>}, {pipeline_mode = #tpu.pipeline_mode<synchronous>, transform_indices = @transform_2, window_bounds = array<i64: 256, 128>}, {transform_indices = @transform_3, window_bounds = array<i64: 8, 128>}]} {
    %c0 = arith.constant 0 : index
    %c0_0 = arith.constant 0 : index
    %0 = vector.load %arg2[%c0, %c0_0] : memref<8x256xf32, #tpu.memory_space<vmem>>, vector<8x256xf32>
    %c0_1 = arith.constant 0 : index
    %c0_2 = arith.constant 0 : index
    %1 = vector.load %arg3[%c0_1, %c0_2] : memref<256x128xf32, #tpu.memory_space<vmem>>, vector<256x128xf32>
    %cst = arith.constant dense<0.000000e+00> : vector<8x128xf32>
    %2 = tpu.matmul %0, %1, %cst {dimension_numbers = #tpu.dot_dimension_numbers<[1], [0], [0], [1], [0, 0, 1, 1], [], []>} : vector<8x256xf32>, vector<256x128xf32>, vector<8x128xf32> -> vector<8x128xf32>
    %c0_3 = arith.constant 0 : index
    %3 = memref.load %arg1[%c0_3] : memref<1xf32, #tpu.memory_space<smem>>
    %4 = vector.broadcast %3 : f32 to vector<8x128xf32>
    %5 = arith.addf %2, %4 : vector<8x128xf32>
    %c0_4 = arith.constant 0 : index
    %c0_5 = arith.constant 0 : index
    %6 = vector.load %arg4[%c0_4, %c0_5] : memref<8x128xf32, #tpu.memory_space<vmem>>, vector<8x128xf32>
    tpu.vector_store %arg4[%c0_4, %c0_5], %5 {strides = array<i32>} : memref<8x128xf32, #tpu.memory_space<vmem>>, vector<8x128xf32>,
    return
  }
  func.func @transform_0(%arg0: i32) -> i32 {
    %c0_i32 = arith.constant 0 : i32
    %c0_i32_0 = arith.constant 0 : i32
    return %c0_i32 : i32
  }
  func.func @transform_1(%arg0: i32) -> (i32, i32) {
    %c0_i32 = arith.constant 0 : i32
    %c0_i32_0 = arith.constant 0 : i32
    return %arg0, %c0_i32 : i32, i32
  }
  func.func @transform_2(%arg0: i32) -> (i32, i32) {
    %c0_i32 = arith.constant 0 : i32
    %c0_i32_0 = arith.constant 0 : i32
    %c0_i32_1 = arith.constant 0 : i32
    return %c0_i32, %c0_i32_0 : i32, i32
  }
  func.func @transform_3(%arg0: i32) -> (i32, i32) {
    %c0_i32 = arith.constant 0 : i32
    %c0_i32_0 = arith.constant 0 : i32
    return %arg0, %c0_i32 : i32, i32
  }
}

</mosaic_0001>

<bundles_post_ra>
// kernel: lin_forward.1
= control target key start
LH: loop header
LB: loop body
LE: loop exit
PB: predicated region body
PF: predicated region fallthrough
CT: control target
= control target key end

     0   :  { %s321_s2 = inlined_call_operand.vmem [shape: f32[256,128], index: 2, kind: input, shape index: {}]   ;;  %s322_s1 = inlined_call_operand.vmem [shape: f32[8,256], index: 1, kind: input, shape index: {}]   ;;  %s323_s0 = inlined_call_operand.<no memory space> [shape: f32[1], index: 0, kind: input, shape index: {}]   ;;  %s324_s3 = inlined_call_operand.vmem [shape: f32[8,128], index: 3, kind: output, shape index: {}]  }
   0x1   :  { %v33_v0 = vld [vmem:[%s321_s2 + $0x80] sm:$0xff]  ;;  %v34_v1 = vld [vmem:[%s321_s2 + $0x88] sm:$0xff]  ;;  %v35_v5 = vld [vmem:[%s321_s2 + $0x90] sm:$0xff]  ;;  %v50_v51 = vstv %s323_s0 }
   0x2   :  { %v17_v2 = vld [vmem:[%s321_s2] sm:$0xff]  ;;  %v161_v3 = vpack.c.bf16 %v34_v1, %v33_v0  ;;  %v18_v4 = vld [vmem:[%s321_s2 + $0x8] sm:$0xff]  ;;  %v36_v6 = vld [vmem:[%s321_s2 + $0x98] sm:$0xff] }
   0x3   :  { %v163_v7 = vpack.c.bf16 %v18_v4, %v17_v2  ;;  %v165_v8 = vpack.c.bf16 %v36_v6, %v35_v5  ;;  %v19_v9 = vld [vmem:[%s321_s2 + $0x10] sm:$0xff]  ;;  %v20_v10 = vld [vmem:[%s321_s2 + $0x18] sm:$0xff]  ;;  %v37_v11 = vld [vmem:[%s321_s2 + $0xa0] sm:$0xff] }
   0x4   :  { %162 = vmatprep.subr.bf16.mxu0 %v161_v3  ;;  %v38_v12 = vld [vmem:[%s321_s2 + $0xa8] sm:$0xff]  ;;  %v167_v13 = vpack.c.bf16 %v20_v10, %v19_v9  ;;  %v21_v15 = vld [vmem:[%s321_s2 + $0x20] sm:$0xff]  ;;  %v39_v17 = vld [vmem:[%s321_s2 + $0xb0] sm:$0xff] }
   0x5   :  { %164 = vmatpush3.bf16.msra.mxu0 %v163_v7  ;;  %v169_v14 = vpack.c.bf16 %v38_v12, %v37_v11  ;;  %v22_v16 = vld [vmem:[%s321_s2 + $0x28] sm:$0xff]  ;;  %v40_v18 = vld [vmem:[%s321_s2 + $0xb8] sm:$0xff]  ;;  %v23_v21 = vld [vmem:[%s321_s2 + $0x30] sm:$0xff] }
   0x6   :  { %166 = vmatprep.subr.bf16.mxu0 %v165_v8  ;;  %v171_v19 = vpack.c.bf16 %v22_v16, %v21_v15  ;;  %v173_v20 = vpack.c.bf16 %v40_v18, %v39_v17  ;;  %v24_v22 = vld [vmem:[%s321_s2 + $0x38] sm:$0xff]  ;;  %v41_v23 = vld [vmem:[%s321_s2 + $0xc0] sm:$0xff]  ;;  %v42_v24 = vld [vmem:[%s321_s2 + $0xc8] sm:$0xff] }
   0x7   :  { %v16_v25 = vld [vmem:[%s322_s1 + $0x8] sm:$0xff]  ;;  %v175_v26 = vpack.c.bf16 %v24_v22, %v23_v21  ;;  %v177_v27 = vpack.c.bf16 %v42_v24, %v41_v23  ;;  %v25_v28 = vld [vmem:[%s321_s2 + $0x40] sm:$0xff]  ;;  %v43_v30 = vld [vmem:[%s321_s2 + $0xd0] sm:$0xff] }
   0x8   :  { %115 = vmatprep.mubr.f32.mxu0 %v16_v25  ;;  %v26_v29 = vld [vmem:[%s321_s2 + $0x48] sm:$0xff]  ;;  %v44_v31 = vld [vmem:[%s321_s2 + $0xd8] sm:$0xff]  ;;  %v27_v34 = vld [vmem:[%s321_s2 + $0x50] sm:$0xff] }
   0x9   :  { %168 = vmatpush3.bf16.msra.mxu0 %v167_v13  ;;  %v179_v32 = vpack.c.bf16 %v26_v29, %v25_v28  ;;  %v181_v33 = vpack.c.bf16 %v44_v31, %v43_v30  ;;  %v28_v35 = vld [vmem:[%s321_s2 + $0x58] sm:$0xff]  ;;  %v45_v36 = vld [vmem:[%s321_s2 + $0xe0] sm:$0xff]  ;;  %v46_v37 = vld [vmem:[%s321_s2 + $0xe8] sm:$0xff] }
   0xa   :  { %170 = vmatprep.subr.bf16.mxu0 %v169_v14  ;;  %v183_v38 = vpack.c.bf16 %v28_v35, %v27_v34  ;;  %v185_v39 = vpack.c.bf16 %v46_v37, %v45_v36  ;;  %v29_v40 = vld [vmem:[%s321_s2 + $0x60] sm:$0xff]  ;;  %v30_v41 = vld [vmem:[%s321_s2 + $0x68] sm:$0xff]  ;;  %v47_v42 = vld [vmem:[%s321_s2 + $0xf0] sm:$0xff] }
   0xb   :  { %v48_v43 = vld [vmem:[%s321_s2 + $0xf8] sm:$0xff]  ;;  %v187_v44 = vpack.c.bf16 %v30_v41, %v29_v40  ;;  %v31_v46 = vld [vmem:[%s321_s2 + $0x70] sm:$0xff]  ;;  %v15_v49 = vld [vmem:[%s322_s1] sm:$0xff] }
   0xc   :  { %v189_v45 = vpack.c.bf16 %v48_v43, %v47_v42  ;;  %v32_v47 = vld [vmem:[%s321_s2 + $0x78] sm:$0xff] }
   0xd   :  { %172 = vmatpush3.bf16.msra.mxu0 %v171_v19  ;;  %v191_v48 = vpack.c.bf16 %v32_v47, %v31_v46 }
   0xe   :  { %174 = vmatprep.subr.bf16.mxu0 %v173_v20 }
  0x11   :  { %176 = vmatpush3.bf16.msra.mxu0 %v175_v26 }
  0x12   :  { %178 = vmatprep.subr.bf16.mxu0 %v177_v27 }
  0x15   :  { %180 = vmatpush3.bf16.msra.mxu0 %v179_v32 }
  0x16   :  { %182 = vmatprep.subr.bf16.mxu0 %v181_v33 }
  0x19   :  { %184 = vmatpush3.bf16.msra.mxu0 %v183_v38 }
  0x1a   :  { %186 = vmatprep.subr.bf16.mxu0 %v185_v39 }
  0x1d   :  { %188 = vmatpush3.bf16.msra.mxu0 %v187_v44 }
  0x1e   :  { %190 = vmatprep.subr.bf16.mxu0 %v189_v45 }
  0x21   :  { %192 = vmatpush3.bf16.msra.mxu0 %v191_v48 }
  0x24   :  { %116 = vmatmul.mubr.f32.vlgmr.msra.gmra.mrb[0].mxu0 %v15_v49 }
  0xf7   :  { %v158_v50 = vpop.f32.mrb[0].mxu0 }
  0xf8   :  { %v159_v52 = vpop.f32.mrb[1].mxu0 }
  0xf9   :  { %v160_v53 = vadd.f32 %v159_v52, %v158_v50 }
  0xfb   :  { %v118_v54 = vadd.f32 %v160_v53, %v50_v51 }
  0xfd   :  { %121 = vst [vmem:[%s324_s3] sm:$0xff] %v118_v54 }

</bundles_post_ra>
